<compile_context>
chip_gen: v5e
topology: v5e:2x2
jax: 0.10.0
libtpu: 0.0.40
codegen_flags: <defaults>
</compile_context>

<pallas_src>
import math
import functools

import jax
import jax.numpy as jnp
from jax.experimental import pallas as pl
from jax.experimental.pallas import tpu as pltpu


def _multi_attention_kernel(x_ref, wconv_ref, bconv_ref,
                            headw_ref, headb_ref, ssum_ref,
                            o_ref, *, n_out):
    # x_ref:     (n_in, B*T)           B samples, sample-major on lanes
    # wconv_ref: (n_out*hidden, n_in)  flattened 1x1 conv weight
    # bconv_ref: (n_out*hidden, 1)
    # headw_ref: (2*n_out, n_out*hidden)  block-diagonal [attw ; claw]
    # headb_ref: (2*n_out, 1)             [attb ; clab]
    # ssum_ref:  (B*T, B)              per-sample lane-sum matrix
    # o_ref:     (1, n_out, B)
    # 1x1 conv == channel matmul (MXU), bias + ReLU
    embed = jnp.dot(wconv_ref[...], x_ref[...],
                    preferred_element_type=jnp.float32)
    embed = jnp.maximum(embed + bconv_ref[...], 0.0)        # (OH, B*T)

    # Both LabelWiseHead reductions as ONE MXU matmul (block-diagonal head).
    logits = jnp.dot(headw_ref[...], embed,
                     preferred_element_type=jnp.float32) + headb_ref[...]
    probs = jax.nn.sigmoid(logits)                          # (2*n_out, B*T)

    eps = 1e-07
    att = jnp.clip(probs[:n_out], eps, 1.0 - eps)           # (n_out, B*T)
    cla = probs[n_out:]                                     # (n_out, B*T)

    # Per-sample sums over the T lanes of each sample: one MXU matmul.
    stacked = jnp.concatenate([att * cla, att], axis=0)     # (2*n_out, B*T)
    sums = jnp.dot(stacked, ssum_ref[...],
                   preferred_element_type=jnp.float32)      # (2*n_out, B)

    # pooled = sum(att*cla) / sum(att)  (exact identity with the reference)
    pooled = sums[:n_out] * pl.reciprocal(sums[n_out:], approx=True)
    o_ref[0] = jnp.clip(pooled, 0.0, 1.0)                   # hardtanh(0, 1)


def multi_attention_forward(x_nchw, wconv, bconv, attw, attb, claw, clab,
                            *, n_out, hidden, block_batch=None):
    """x_nchw: (N, n_in, T, 1) float32  ->  (N, n_out) float32"""
    N, C, T, _ = x_nchw.shape
    OH = n_out * hidden

    # Pick B so the x-block lane width (B*T) is a multiple of 128.
    B = 128 // math.gcd(T, 128)
    if block_batch is not None:
        assert block_batch % B == 0, (block_batch, B)
        B = block_batch
    n_pad = ((N + B - 1) // B) * B
    num_blocks = n_pad // B

    x3 = x_nchw[..., 0]                                     # (N, C, T)
    if n_pad != N:
        x3 = jnp.pad(x3, ((0, n_pad - N), (0, 0), (0, 0)))
    # (C, N_pad*T): channels on sublanes, sample-major time on lanes.
    x2d = jnp.transpose(x3, (1, 0, 2)).reshape(C, n_pad * T)

    wconv_flat = wconv.reshape(OH, C)
    bconv2 = bconv.reshape(OH, 1)

    # Block-diagonal fused head: H[o, o*hidden+h] = attw[o,h];
    #                            H[n_out+o, o*hidden+h] = claw[o,h].
    eye = jnp.eye(n_out, dtype=jnp.float32)
    att_bd = (eye[:, :, None] * attw[None, :, :]).reshape(n_out, OH)
    cla_bd = (eye[:, :, None] * claw[None, :, :]).reshape(n_out, OH)
    head_w = jnp.concatenate([att_bd, cla_bd], axis=0)      # (2*n_out, OH)
    head_b = jnp.concatenate([attb, clab]).reshape(2 * n_out, 1)

    # (B*T, B) summation matrix: column c belongs to sample c // T.
    col_sample = jnp.arange(B * T, dtype=jnp.int32) // T
    ssum = (col_sample[:, None] ==
            jnp.arange(B, dtype=jnp.int32)[None, :]).astype(jnp.float32)

    kernel = functools.partial(_multi_attention_kernel, n_out=n_out)

    out = pl.pallas_call(
        kernel,
        out_shape=jax.ShapeDtypeStruct((num_blocks, n_out, B), jnp.float32),
        grid_spec=pltpu.PrefetchScalarGridSpec(
            num_scalar_prefetch=0,
            grid=(num_blocks,),
            in_specs=[
                pl.BlockSpec((C, B * T), lambda g: (0, g)),
                pl.BlockSpec((OH, C), lambda g: (0, 0)),
                pl.BlockSpec((OH, 1), lambda g: (0, 0)),
                pl.BlockSpec((2 * n_out, OH), lambda g: (0, 0)),
                pl.BlockSpec((2 * n_out, 1), lambda g: (0, 0)),
                pl.BlockSpec((B * T, B), lambda g: (0, 0)),
            ],
            out_specs=pl.BlockSpec((1, n_out, B), lambda g: (g, 0, 0)),
        ),
        compiler_params=pltpu.CompilerParams(
            dimension_semantics=("parallel",)),
    )(x2d, wconv_flat, bconv2, head_w, head_b, ssum)

    # (num_blocks, n_out, B) -> (N, n_out)
    out = jnp.transpose(out, (0, 2, 1)).reshape(n_pad, n_out)
    return out[:N]


def multi_attention_reference(x_nchw, wconv, bconv, attw, attb, claw, clab,
                              *, n_out, hidden):
    """Pure-JAX reference matching the PyTorch forward."""
    N, C, T, _ = x_nchw.shape
    w = wconv.reshape(n_out * hidden, C)
    embed = jax.nn.relu(jnp.einsum('oc,nct->not', w, x_nchw[..., 0])
                        + bconv[None, :, None])
    embed3 = embed.reshape(N, n_out, hidden, T)
    att = jax.nn.sigmoid(jnp.sum(embed3 * attw[None, :, :, None], axis=2)
                         + attb[None, :, None])
    cla = jax.nn.sigmoid(jnp.sum(embed3 * claw[None, :, :, None], axis=2)
                         + clab[None, :, None])
    eps = 1e-07
    att = jnp.clip(att, eps, 1.0 - eps)
    norm_att = att / jnp.sum(att, axis=2, keepdims=True)
    return jnp.clip(jnp.sum(norm_att * cla, axis=2), 0.0, 1.0)


if __name__ == "__main__":
    # Small shapes consistent with forward(): input (N, freq_bins, time_steps, 1).
    # T=16 -> B=8 samples/block; N=16 -> grid of 2 "parallel" steps.
    N, n_in, T = 16, 8, 16
    hidden, n_out = 16, 4

    key = jax.random.PRNGKey(0)
    kx, kw, ka, kc = jax.random.split(key, 4)

    # Deterministic parameter init mirroring init_layer():
    #  - conv weight uniform(-scale, scale), scale = sqrt(2/n)*sqrt(3), n = n_in*1*1
    #  - LabelWiseHead weights uniform with n = hidden; all biases zero
    conv_scale = math.sqrt(2.0 / (n_in * 1 * 1)) * math.sqrt(3.0)
    head_scale = math.sqrt(2.0 / hidden) * math.sqrt(3.0)

    wconv = jax.random.uniform(kw, (n_out * hidden, n_in, 1, 1),
                               minval=-conv_scale, maxval=conv_scale,
                               dtype=jnp.float32)
    bconv = jnp.zeros((n_out * hidden,), jnp.float32)
    attw = jax.random.uniform(ka, (n_out, hidden),
                              minval=-head_scale, maxval=head_scale,
                              dtype=jnp.float32)
    attb = jnp.zeros((n_out,), jnp.float32)
    claw = jax.random.uniform(kc, (n_out, hidden),
                              minval=-head_scale, maxval=head_scale,
                              dtype=jnp.float32)
    clab = jnp.zeros((n_out,), jnp.float32)

    x = jax.random.normal(kx, (N, n_in, T, 1), dtype=jnp.float32)

    out = multi_attention_forward(x, wconv, bconv, attw, attb, claw, clab,
                                  n_out=n_out, hidden=hidden)
    out = jax.block_until_ready(out)

    ref = multi_attention_reference(x, wconv, bconv, attw, attb, claw, clab,
                                    n_out=n_out, hidden=hidden)
    ref = jax.block_until_ready(ref)

    assert out.shape == (N, n_out), out.shape
    # Tolerance accounts for the EUP approximate reciprocal in the kernel.
    assert jnp.allclose(out, ref, rtol=2e-3, atol=2e-3), (out, ref)
    print("KERNEL_OK")
</pallas_src>

<mosaic_0001>
module attributes {stable_mosaic.version = 11 : i64} {
  func.func @_multi_attention_kernel(%arg0: i32, %arg1: memref<8x128xf32, #tpu.memory_space<vmem>>, %arg2: memref<64x8xf32, #tpu.memory_space<vmem>>, %arg3: memref<64x1xf32, #tpu.memory_space<vmem>>, %arg4: memref<8x64xf32, #tpu.memory_space<vmem>>, %arg5: memref<8x1xf32, #tpu.memory_space<vmem>>, %arg6: memref<128x8xf32, #tpu.memory_space<vmem>>, %arg7: memref<1x4x8xf32, #tpu.memory_space<vmem>>) attributes {dimension_semantics = [#tpu.dimension_semantics<parallel>], iteration_bounds = array<i64: 2>, scalar_prefetch = 0 : i64, scratch_operands = 0 : i64, tpu.core_type = #tpu.core_type<tc>, window_params = [{transform_indices = @transform_0, window_bounds = array<i64: 8, 128>}, {pipeline_mode = #tpu.pipeline_mode<synchronous>, transform_indices = @transform_1, window_bounds = array<i64: 64, 8>}, {pipeline_mode = #tpu.pipeline_mode<synchronous>, transform_indices = @transform_2, window_bounds = array<i64: 64, 1>}, {pipeline_mode = #tpu.pipeline_mode<synchronous>, transform_indices = @transform_3, window_bounds = array<i64: 8, 64>}, {pipeline_mode = #tpu.pipeline_mode<synchronous>, transform_indices = @transform_4, window_bounds = array<i64: 8, 1>}, {pipeline_mode = #tpu.pipeline_mode<synchronous>, transform_indices = @transform_5, window_bounds = array<i64: 128, 8>}, {transform_indices = @transform_6, window_bounds = array<i64: 1, 4, 8>}]} {
    %c0 = arith.constant 0 : index
    %c0_0 = arith.constant 0 : index
    %0 = vector.load %arg2[%c0, %c0_0] : memref<64x8xf32, #tpu.memory_space<vmem>>, vector<64x8xf32>
    %c0_1 = arith.constant 0 : index
    %c0_2 = arith.constant 0 : index
    %1 = vector.load %arg1[%c0_1, %c0_2] : memref<8x128xf32, #tpu.memory_space<vmem>>, vector<8x128xf32>
    %cst = arith.constant dense<0.000000e+00> : vector<64x128xf32>
    %2 = tpu.matmul %0, %1, %cst {dimension_numbers = #tpu.dot_dimension_numbers<[1], [0], [0], [1], [0, 0, 1, 1], [], []>} : vector<64x8xf32>, vector<8x128xf32>, vector<64x128xf32> -> vector<64x128xf32>
    %c0_3 = arith.constant 0 : index
    %c0_4 = arith.constant 0 : index
    %3 = vector.load %arg3[%c0_3, %c0_4] : memref<64x1xf32, #tpu.memory_space<vmem>>, vector<64x1xf32>
    %4 = vector.broadcast %3 : vector<64x1xf32> to vector<64x128xf32>
    %5 = arith.addf %2, %4 : vector<64x128xf32>
    %cst_5 = arith.constant 0.000000e+00 : f32
    %6 = vector.broadcast %cst_5 : f32 to vector<64x128xf32>
    %7 = arith.maximumf %5, %6 : vector<64x128xf32>
    %c0_6 = arith.constant 0 : index
    %c0_7 = arith.constant 0 : index
    %8 = vector.load %arg4[%c0_6, %c0_7] : memref<8x64xf32, #tpu.memory_space<vmem>>, vector<8x64xf32>
    %cst_8 = arith.constant dense<0.000000e+00> : vector<8x128xf32>
    %9 = tpu.matmul %8, %7, %cst_8 {dimension_numbers = #tpu.dot_dimension_numbers<[1], [0], [0], [1], [0, 0, 1, 1], [], []>} : vector<8x64xf32>, vector<64x128xf32>, vector<8x128xf32> -> vector<8x128xf32>
    %c0_9 = arith.constant 0 : index
    %c0_10 = arith.constant 0 : index
    %10 = vector.load %arg5[%c0_9, %c0_10] : memref<8x1xf32, #tpu.memory_space<vmem>>, vector<8x1xf32>
    %11 = vector.broadcast %10 : vector<8x1xf32> to vector<8x128xf32>
    %12 = arith.addf %9, %11 : vector<8x128xf32>
    %13 = arith.negf %12 : vector<8x128xf32>
    %14 = math.exp %13 : vector<8x128xf32>
    %cst_11 = arith.constant 1.000000e+00 : f32
    %15 = vector.broadcast %cst_11 : f32 to vector<8x128xf32>
    %16 = arith.addf %15, %14 : vector<8x128xf32>
    %17 = arith.divf %15, %16 : vector<8x128xf32>
    %18 = vector.extract_strided_slice %17 {offsets = [0, 0], sizes = [4, 128], strides = [1, 1]} : vector<8x128xf32> to vector<4x128xf32>
    %cst_12 = arith.constant 1.000000e-07 : f32
    %cst_13 = arith.constant 0.99999988 : f32
    %19 = vector.broadcast %cst_12 : f32 to vector<4x128xf32>
    %20 = arith.maximumf %19, %18 : vector<4x128xf32>
    %21 = vector.broadcast %cst_13 : f32 to vector<4x128xf32>
    %22 = arith.minimumf %21, %20 : vector<4x128xf32>
    %23 = vector.extract_strided_slice %17 {offsets = [4, 0], sizes = [4, 128], strides = [1, 1]} : vector<8x128xf32> to vector<4x128xf32>
    %24 = arith.mulf %22, %23 : vector<4x128xf32>
    %25 = tpu.concatenate %24, %22 in 0 : vector<4x128xf32>, vector<4x128xf32> -> vector<8x128xf32>
    %c0_14 = arith.constant 0 : index
    %c0_15 = arith.constant 0 : index
    %26 = vector.load %arg6[%c0_14, %c0_15] : memref<128x8xf32, #tpu.memory_space<vmem>>, vector<128x8xf32>
    %cst_16 = arith.constant dense<0.000000e+00> : vector<8x8xf32>
    %27 = tpu.matmul %25, %26, %cst_16 {dimension_numbers = #tpu.dot_dimension_numbers<[1], [0], [0], [1], [0, 0, 1, 1], [], []>} : vector<8x128xf32>, vector<128x8xf32>, vector<8x8xf32> -> vector<8x8xf32>
    %28 = vector.extract_strided_slice %27 {offsets = [0, 0], sizes = [4, 8], strides = [1, 1]} : vector<8x8xf32> to vector<4x8xf32>
    %29 = vector.extract_strided_slice %27 {offsets = [4, 0], sizes = [4, 8], strides = [1, 1]} : vector<8x8xf32> to vector<4x8xf32>
    %30 = tpu.reciprocal %29 {approx = true} : vector<4x8xf32> -> vector<4x8xf32>
    %31 = arith.mulf %28, %30 : vector<4x8xf32>
    %cst_17 = arith.constant 0.000000e+00 : f32
    %cst_18 = arith.constant 1.000000e+00 : f32
    %32 = vector.broadcast %cst_17 : f32 to vector<4x8xf32>
    %33 = arith.maximumf %32, %31 : vector<4x8xf32>
    %34 = vector.broadcast %cst_18 : f32 to vector<4x8xf32>
    %35 = arith.minimumf %34, %33 : vector<4x8xf32>
    %c0_19 = arith.constant 0 : index
    %c0_20 = arith.constant 0 : index
    %c0_21 = arith.constant 0 : index
    %36 = vector.load %arg7[%c0_19, %c0_20, %c0_21] : memref<1x4x8xf32, #tpu.memory_space<vmem>>, vector<1x4x8xf32>
    %37 = vector.shape_cast %36 : vector<1x4x8xf32> to vector<4x8xf32>
    %38 = vector.shape_cast %35 : vector<4x8xf32> to vector<1x4x8xf32>
    tpu.vector_store %arg7[%c0_19, %c0_20, %c0_21], %38 {strides = array<i32>} : memref<1x4x8xf32, #tpu.memory_space<vmem>>, vector<1x4x8xf32>,
    return
  }
  func.func @transform_0(%arg0: i32) -> (i32, i32) {
    %c0_i32 = arith.constant 0 : i32
    %c0_i32_0 = arith.constant 0 : i32
    return %c0_i32, %arg0 : i32, i32
  }
  func.func @transform_1(%arg0: i32) -> (i32, i32) {
    %c0_i32 = arith.constant 0 : i32
    %c0_i32_0 = arith.constant 0 : i32
    %c0_i32_1 = arith.constant 0 : i32
    return %c0_i32, %c0_i32_0 : i32, i32
  }
  func.func @transform_2(%arg0: i32) -> (i32, i32) {
    %c0_i32 = arith.constant 0 : i32
    %c0_i32_0 = arith.constant 0 : i32
    %c0_i32_1 = arith.constant 0 : i32
    return %c0_i32, %c0_i32_0 : i32, i32
  }
  func.func @transform_3(%arg0: i32) -> (i32, i32) {
    %c0_i32 = arith.constant 0 : i32
    %c0_i32_0 = arith.constant 0 : i32
    %c0_i32_1 = arith.constant 0 : i32
    return %c0_i32, %c0_i32_0 : i32, i32
  }
  func.func @transform_4(%arg0: i32) -> (i32, i32) {
    %c0_i32 = arith.constant 0 : i32
    %c0_i32_0 = arith.constant 0 : i32
    %c0_i32_1 = arith.constant 0 : i32
    return %c0_i32, %c0_i32_0 : i32, i32
  }
  func.func @transform_5(%arg0: i32) -> (i32, i32) {
    %c0_i32 = arith.constant 0 : i32
    %c0_i32_0 = arith.constant 0 : i32
    %c0_i32_1 = arith.constant 0 : i32
    return %c0_i32, %c0_i32_0 : i32, i32
  }
  func.func @transform_6(%arg0: i32) -> (i32, i32, i32) {
    %c0_i32 = arith.constant 0 : i32
    %c0_i32_0 = arith.constant 0 : i32
    %c0_i32_1 = arith.constant 0 : i32
    return %arg0, %c0_i32, %c0_i32_0 : i32, i32, i32
  }
}

</mosaic_0001>

<bundles_post_ra>
// kernel: tpu_custom_call.1
= control target key start
LH: loop header
LB: loop body
LE: loop exit
PB: predicated region body
PF: predicated region fallthrough
CT: control target
= control target key end

     0   :  { %11 = vsyncpa [#allocation3], 0  ;;  %s924_s0 = inlined_call_operand.vmem [shape: f32[8,256], index: 0, kind: input, shape index: {}]   ;;  %s925_s1 = inlined_call_operand.vmem [shape: f32[64,8], index: 1, kind: input, shape index: {}]   ;;  %s926_s2 = inlined_call_operand.vmem [shape: f32[64,1], index: 2, kind: input, shape index: {}]   ;;  %s927_s3 = inlined_call_operand.vmem [shape: f32[8,64], index: 3, kind: input, shape index: {}]   ;;  %s928_s4 = inlined_call_operand.vmem [shape: f32[8,1], index: 4, kind: input, shape index: {}]   ;;  %s929_s5 = inlined_call_operand.vmem [shape: f32[128,8], index: 5, kind: input, shape index: {}]   ;;  %s930_s6 = inlined_call_operand.hbm [shape: f32[2,4,8], index: 6, kind: output, shape index: {}]  }
   0x1   :  { %13 = vsyncpa [#allocation3 + $0x1], 0  ;;  %s729_s21 = smov 0   ;;  %s731_s22 = smov 0  }
   0x2   :  { %s733_s23 = smov 0   ;;  %s735_s24 = smov 0  }
   0x3 LB: > { %s750_s25 = sadd.s32 4294967295, %s691_s24   ;;  %s559_s26 = sadd.s32 4294967294, %s691_s24   ;;  %s691_s24 = sphi %s735_s24, %s936_s24   ;;  %s687_s23 = sphi %s733_s23, %s935_s23   ;;  %s683_s22 = sphi %s731_s22, %s934_s22   ;;  %s679_s21 = sphi %s729_s21, %s933_s21  }
   0x4   : > { %s754_s27 = sadd.s32 1, %s691_s24   ;;  %s157_s28 = sadd.s32 1, %s687_s23 }
   0x5   : > { %s154_s29 = ssub.s32 %s691_s24, %s754_s27  ;;  %p167_p0 = scmp.ne.s32.totalorder %s687_s23, %s683_s22 }
   0x6   : > { %p155_p1 = scmp.eq.s32.totalorder %s154_s29, 0  ;;  %p168_p2 = scmp.eq.s32.totalorder %s750_s25, 1 }
   0x7   : > { %p173_p3 = scmp.ne.s32.totalorder %s683_s22, %s679_s21  ;;  %p174_p4 = scmp.eq.s32.totalorder %s559_s26, 1 }
   0x8   : > { %s765_s30 = scalar_select %p155_p1, %s687_s23, %s157_s28  }
   0x9   : > { %p767_p5 = por %p168_p2, %p167_p0  ;;  %p771_p6 = por %p174_p4, %p173_p3 }
   0xa   : > { %p562_p7 = scmp.ge.s32.totalorder %s691_s24, 1  ;;  %p214_p8 = scmp.lt.s32.totalorder %s691_s24, 3 }
   0xc   : > { %p215_p9 = pnand %p562_p7, %p214_p8 }
   0xd   : > { %p243_p10 = scmp.lt.s32.totalorder (!%p215_p9), %s750_s25, 1  ;;  %s240_s28 = sand.u32 (!%p215_p9), 1, %s683_s22  }
   0xe   : > { %218 = sbr.rel (%p215_p9) target bundleno = 513 (0x201), region = 44  ;;  %s563_s29 = sshll.u32 (!%p215_p9), %s240_s28, 2 }
   0xf   : > { %s576_s9 = sshll.u32 (!%p215_p9), %s750_s25, 2  ;;  %s242_s13 = scalar_lea.vmem (!%p215_p9), [#allocation2], %s563_s29 }
  0x10   : > { %s495_s12 = scalar_lea.hbm (!%p215_p9), %s930_s6, %s576_s9  ;;  %s485_s16 = scalar_lea.sflag (!%p215_p9), [#allocation3], %s240_s28 }
  0x11   : > { %s499_s15 = sshll.u32 (!%p215_p9), %s495_s12, 4  ;;  %s649_s20 = scalar_lea.hbm (!%p215_p9), %s930_s6, 8  ;;  %s500_s15 = int_to_ptr.hbm [resolvable:$true] %s499_s15 }
  0x12   : > { %s643_s17 = sshra.s32 (!%p215_p9), %s500_s15, 4  ;;  %s644_s17 = int_to_ptr.hbm [resolvable:$true] %s643_s17 }
  0x13   : > { %v693_v0 = vmov 0   ;;  %v261_v1 = vld [vmem:[%s926_s2 + $0x28] sm:$0xff]  ;;  %s244_s11 = scalar_select %p243_p10, %s750_s25, 1  ;;  %v263_v2 = vld [vmem:[%s926_s2 + $0x38] sm:$0xff]  ;;  %v251_v4 = vld [vmem:[%s925_s1 + $0x20] sm:$0xff]  ;;  %vm304_vm0 = vcmask 64512  }
  0x14   : > { %621 = vset.pattern.permute.xlu1 %v693_v0  ;;  %620 = vset.pattern.permute.xlu0 %v693_v0  ;;  %v259_v3 = vld [vmem:[%s926_s2 + $0x18] sm:$0xff]  ;;  %v247_v5 = vld [vmem:[%s925_s1] sm:$0xff]  ;;  %v262_v8 = vld [vmem:[%s926_s2 + $0x30] sm:$0xff]  ;;  %vm385_vm1 = vcmask 523264   ;;  %vm437_vm6 = vcmask 1043456   ;;  %vm482_vm7 = vcmask 60416   ;;  %p650_p0 = scmp.lt.s32.totalorder %s644_s17, %s930_s6 }
  0x15   : > { %291 = vperm.xlu1 %621, %v261_v1   ;;  %622 = vset.pattern.permute.xlu2 %v693_v0  ;;  %s564_s14 = sshll.u32 %s244_s11, 3  ;;  %v260_v7 = vld [vmem:[%s926_s2 + $0x20] sm:$0xff]  ;;  %v258_v9 = vld [vmem:[%s926_s2 + $0x10] sm:$0xff]  ;;  %v252_v10 = vld [vmem:[%s925_s1 + $0x28] sm:$0xff]  ;;  %s645_s25 = scalar_lea.hbm %s644_s17, 4 }
  0x16   : > { %301 = vperm.xlu0 %620, %v263_v2   ;;  %s246_s19 = scalar_lea.vmem %s924_s0, %s564_s14  ;;  %281 = vperm.xlu2 %622, %v259_v3   ;;  %v248_v11 = vld [vmem:[%s925_s1 + $0x8] sm:$0xff]  ;;  %v256_v12 = vld [vmem:[%s926_s2] sm:$0xff]  ;;  %v253_v15 = vld [vmem:[%s925_s1 + $0x30] sm:$0xff]  ;;  %s497_s14 = sshll.u32 %s242_s13, 4  ;;  %s498_s14 = int_to_ptr.vmem [resolvable:$true] %s497_s14 }
  0x17   : > { %v255_v6 = vld [vmem:[%s246_s19] sm:$0xff]  ;;  %v257_v13 = vld [vmem:[%s926_s2 + $0x8] sm:$0xff]  ;;  %v249_v16 = vld [vmem:[%s925_s1 + $0x10] sm:$0xff]  ;;  %p646_p11 = scmp.ne.s32.totalorder %s644_s17, %s645_s25  ;;  %p651_p1 = scmp.lt.s32.totalorder %s649_s20, %s645_s25 }
  0x18   : > { %579 = vmatpush.msra.mxu3 %v255_v6  ;;  %344 = vmatpush.msra.mxu0 %v255_v6  ;;  %v379_v14 = vld [vmem:[%s928_s4] sm:$0xff]  ;;  %v254_v17 = vld [vmem:[%s925_s1 + $0x38] sm:$0xff]  ;;  %v453_v53 = vld [vmem:[%s929_s5 + $0x70] sm:$0xff] }
  0x19   : > { %569 = vmatmul.msk.f32.vlgmr.msra.gmra.mxu3 %vm304_vm0, %v251_v4  ;;  %565 = vmatmul.msk.f32.vlgmr.msra.gmra.mxu0 %vm304_vm0, %v247_v5  ;;  %v250_v18 = vld [vmem:[%s925_s1 + $0x18] sm:$0xff]  ;;  %v378_v51 = vld [vmem:[%s927_s3] sm:$0xff]  ;;  %v452_v54 = vld [vmem:[%s929_s5 + $0x68] sm:$0xff]  ;;  %p647_p12 = pnand %p646_p11, %p767_p5  ;;  %p652_p2 = por %p651_p1, %p650_p0 }
  0x1a   : > { %v454_v52 = vld [vmem:[%s929_s5 + $0x78] sm:$0xff]  ;;  %v451_v55 = vld [vmem:[%s929_s5 + $0x60] sm:$0xff]  ;;  %v449_v57 = vld [vmem:[%s929_s5 + $0x50] sm:$0xff] }
  0x1b   : > { %455 = vmatpush.msra.mxu2 %v454_v52  ;;  %v450_v56 = vld [vmem:[%s929_s5 + $0x58] sm:$0xff]  ;;  %v448_v58 = vld [vmem:[%s929_s5 + $0x48] sm:$0xff]  ;;  %v447_v59 = vld [vmem:[%s929_s5 + $0x40] sm:$0xff]  ;;  %p648_p13 = pneg %p647_p12 }
  0x1c   : > { %v446_v60 = vld [vmem:[%s929_s5 + $0x38] sm:$0xff]  ;;  %v445_v61 = vld [vmem:[%s929_s5 + $0x30] sm:$0xff]  ;;  %v444_v62 = vld [vmem:[%s929_s5 + $0x28] sm:$0xff] }
  0x1d   : > { %286 = vperm.xlu1 %621, %v260_v7   ;;  %456 = vmatpush.msra.mxu2 %v453_v53  ;;  %v443_v63 = vld [vmem:[%s929_s5 + $0x20] sm:$0xff]  ;;  %v442_v0 = vld [vmem:[%s929_s5 + $0x18] sm:$0xff]  ;;  %v441_v1 = vld [vmem:[%s929_s5 + $0x10] sm:$0xff]  ;;  %p653_p3 = pnand %p652_p2, %p648_p13 }
  0x1e   : > { %296 = vperm.xlu0 %620, %v262_v8   ;;  %276 = vperm.xlu2 %622, %v258_v9   ;;  %v440_v4 = vld [vmem:[%s929_s5 + $0x8] sm:$0xff]  ;;  %v439_v6 = vld [vmem:[%s929_s5] sm:$0xff] }
  0x1f   : > { %457 = vmatpush.msra.mxu2 %v452_v54 }
  0x21   : > { %570 = vmatmul.msk.f32.gmra.mxu3 %vm304_vm0, %v252_v10  ;;  %566 = vmatmul.msk.f32.gmra.mxu0 %vm304_vm0, %v248_v11 }
  0x22   : > { %458 = vmatpush.msra.mxu2 %v451_v55 }
  0x24   : > { %459 = vmatpush.msra.mxu2 %v450_v56 }
  0x25   : > { %266 = vperm.xlu1 %621, %v256_v12  }
  0x26   : > { %271 = vperm.xlu0 %620, %v257_v13   ;;  %382 = vperm.xlu2 %622, %v379_v14  }
  0x27   : > { %460 = vmatpush.msra.mxu2 %v449_v57 }
  0x29   : > { %571 = vmatmul.msk.f32.gmra.mxu3 %vm304_vm0, %v253_v15  ;;  %567 = vmatmul.msk.f32.gmra.mxu0 %vm304_vm0, %v249_v16 }
  0x2a   : > { %461 = vmatpush.msra.mxu2 %v448_v58 }
  0x2c   : > { %462 = vmatpush.msra.mxu2 %v447_v59 }
  0x2e   : > { %463 = vmatpush.msra.mxu2 %v446_v60 }
  0x30   : > { %464 = vmatpush.msra.mxu2 %v445_v61 }
  0x31   : > { %572 = vmatmul.msk.f32.gmra.mxu3 %vm304_vm0, %v254_v17  ;;  %568 = vmatmul.msk.f32.gmra.mxu0 %vm304_vm0, %v250_v18 }
  0x32   : > { %465 = vmatpush.msra.mxu2 %v444_v62 }
  0x34   : > { %466 = vmatpush.msra.mxu2 %v443_v63 }
  0x36   : > { %467 = vmatpush.msra.mxu2 %v442_v0 }
  0x38   : > { %468 = vmatpush.msra.mxu2 %v441_v1 }
  0x3a   : > { %469 = vmatpush.msra.mxu2 %v440_v4 }
  0x3c   : > { %470 = vmatpush.msra.mxu2 %v439_v6 }
  0x70   : > { %v282_v28 = vpop.permute.xlu2 %281 }
  0x78   : > { %v277_v41 = vpop.permute.xlu2 %276 }
  0x80   : > { %v383_v2 = vpop.permute.xlu2 %382 }
  0x87   : > { %v292_v24 = vpop.permute.xlu1 %291 }
  0x88   : > { %v302_v23 = vpop.permute.xlu0 %301 }
  0x8f   : > { %v287_v29 = vpop.permute.xlu1 %286 }
  0x90   : > { %v297_v27 = vpop.permute.xlu0 %296 }
  0x96   : > { %v346_v19 = vpop.f32.mrf.mxu0 }
  0x97   : > { %v267_v44 = vpop.permute.xlu1 %266 }
  0x98   : > { %v272_v40 = vpop.permute.xlu0 %271  ;;  %v347_v47 = vadd.f32 %v346_v19, %v267_v44 }
  0x9a   : > { %v370_v50 = vmax.f32 %v347_v47, 0.0 }
  0x9c   : > { %v358_v20 = vpop.f32.mrf.mxu3 }
  0x9d   : > { %v359_v36 = vadd.f32 %v358_v20, %v287_v29 }
  0x9e   : > { %v349_v22 = vpop.f32.mrf.mxu0 }
  0x9f   : > { %v374_v42 = vmax.f32 %v359_v36, 0.0  ;;  %v350_v45 = vadd.f32 %v349_v22, %v272_v40 }
  0xa1   : > { %v371_v49 = vmax.f32 %v350_v45, 0.0 }
  0xa4   : > { %v361_v21 = vpop.f32.mrf.mxu3 }
  0xa5   : > { %v362_v33 = vadd.f32 %v361_v21, %v292_v24 }
  0xa6   : > { %v352_v26 = vpop.f32.mrf.mxu0 }
  0xa7   : > { %v375_v38 = vmax.f32 %v362_v33, 0.0  ;;  %v353_v43 = vadd.f32 %v352_v26, %v277_v41 }
  0xa9   : > { %v372_v48 = vmax.f32 %v353_v43, 0.0 }
  0xac   : > { %v364_v25 = vpop.f32.mrf.mxu3 }
  0xad   : > { %v365_v31 = vadd.f32 %v364_v25, %v297_v27 }
  0xae   : > { %v355_v35 = vpop.f32.mrf.mxu0 }
  0xaf   : > { %v376_v37 = vmax.f32 %v365_v31, 0.0  ;;  %v356_v39 = vadd.f32 %v355_v35, %v282_v28 }
  0xb1   : > { %v373_v46 = vmax.f32 %v356_v39, 0.0 }
  0xb4   : > { %v367_v30 = vpop.f32.mrf.mxu3 }
  0xb5   : > { %v368_v32 = vadd.f32 %v367_v30, %v302_v23 }
  0xb7   : > { %v377_v34 = vmax.f32 %v368_v32, 0.0 }
  0xb9   : > { %397 = vmatpush.msra.mxu1 %v377_v34 }
  0xbb   : > { %398 = vmatpush.msra.mxu1 %v376_v37 }
  0xbd   : > { %399 = vmatpush.msra.mxu1 %v375_v38 }
  0xbf   : > { %400 = vmatpush.msra.mxu1 %v374_v42 }
  0xc1   : > { %401 = vmatpush.msra.mxu1 %v373_v46 }
  0xc3   : > { %402 = vmatpush.msra.mxu1 %v372_v48 }
  0xc5   : > { %403 = vmatpush.msra.mxu1 %v371_v49 }
  0xc7   : > { %404 = vmatpush.msra.mxu1 %v370_v50 }
  0xc8   : > { %573 = vmatmul.msk.f32.vlgmr.msra.gmra.mxu1 %vm385_vm1, %v378_v51 }
 0x145   : > { %v406_v3 = vpop.f32.mrf.mxu1 }
 0x146   : > { %v407_v5 = vadd.f32 %v406_v3, %v383_v2 }
 0x148   : > { %v574_v7 = vmul.f32 -1.442695, %v407_v5 }
 0x14a   : > { %623 = vpow2.f32 %v574_v7 }
 0x150   : > { %v624_v8 = vpop.eup %623 }
 0x151   : > { %v412_v9 = vadd.f32 1.0, %v624_v8 }
 0x153   : > { %625 = vrcp.f32 %v412_v9  ;;  %v424_v13 = vand.u32 2147483648, %v412_v9  ;;  %v422_v15 = vand.u32 2147483647, %v412_v9  ;;  %vm418_vm3 = vweird.f32 %v412_v9 }
 0x155   : > { %v425_v17 = vor.u32 1.1754944e-38, %v424_v13  ;;  %vm423_vm5 = vcmp.eq.f32.partialorder %v422_v15, 8.507059e+37 }
 0x159   : > { %v626_v10 = vpop.eup %625 }
 0x15a   : > { %v414_v11 = vmul.f32 %v626_v10, %v412_v9  ;;  %vm419_vm2 = vweird.f32 %v626_v10 }
 0x15b   : > { %vm420_vm4 = vmor %vm418_vm3, %vm419_vm2 }
 0x15c   : > { %v415_v12 = vsub.f32 1.0, %v414_v11 }
 0x15e   : > { %v416_v14 = vmul.f32 %v626_v10, %v415_v12 }
 0x160   : > { %v417_v16 = vadd.f32 %v626_v10, %v416_v14 }
 0x162   : > { %v421_v18 = vsel %vm420_vm4, %v626_v10, %v417_v16 }
 0x163   : > { %v426_v19 = vsel %vm423_vm5, %v425_v17, %v421_v18 }
 0x164   : > { %v428_v20 = vmax.f32 %v426_v19, 1e-07  ;;  %v431_v22 = vrot.slane %v426_v19, 4 }
 0x166   : > { %v429_v21 = vmin.f32 %v428_v20, 0.9999999 }
 0x168   : > { %v433_v23 = vmul.f32 %v431_v22, %v429_v21  ;;  %v435_v24 = vrot.slane %v429_v21, 4 }
 0x16a   : > { %v438_v25 = vsel %vm437_vm6, %v433_v23, %v435_v24 }
 0x16b   : > { %471 = vmatmul.f32.vlgmr.msra.gmra.mxu2 %v438_v25 }
 0x1ee   : > { %v472_v26 = vpop.f32.mrf.mxu2 }
 0x1ef   : > { %627 = vrcp.f32 %v472_v26 }
 0x1f5   : > { %v628_v27 = vpop.eup %627 }
 0x1f6   : > { %v477_v28 = vrot.slane %v628_v27, 4 }
 0x1f8   : > { %v479_v29 = vmul.f32 %v477_v28, %v472_v26 }
 0x1fa   : > { %v480_v30 = vmax.f32 %v479_v29, 0.0 }
 0x1fc   : > { %v481_v31 = vmin.f32 %v480_v30, 1.0 }
 0x1fe   : > { %483 = vst.msk [vmem:[%s242_s13] sm:$0xf] %vm482_vm7, %v481_v31 }
 0x1ff   : > { %656 = shalt.err (!%p653_p3)
}
 0x200   : > { %580 = dma.vmem_to_hbm [thread:$0]  (%p767_p5), %s498_s14, 64, %s500_s15, %s485_s16  }
 0x201 PF: > { %p586_p4 = scmp.ge.s32.totalorder %s691_s24, 2  ;;  %s511_s28 = sand.u32 1, %s679_s21  }
 0x202   : > { %s512_s9 = scalar_lea.sflag [#allocation3], %s511_s28 }
 0x203   : > { %p583_p7 = pnand %p586_p4, %p771_p6 }
 0x205   : > { %p584_p8 = pneg %p583_p7 }
 0x207   : > { %674 = dma.done.wait (%p584_p8), %s512_s9, 64  }
 0x208   : > { %676 = vsyncadd (%p584_p8), %s512_s9, 4294967232  ;;  %p16_p9 = scmp.ge.s32.totalorder %s754_s27, 4   ;;  %s933_s21 = smov %s683_s22 }
 0x209   : > { %s934_s22 = smov %s687_s23  ;;  %s935_s23 = smov %s765_s30 }
 0x20a   : > { %s936_s24 = smov %s754_s27  ;;  %18 = sbr.rel (!%p16_p9) target bundleno = 3 (0x3), region = 79 }
 0x20f   :  { %518 = vsyncpa [#allocation3], 1 }
 0x210   :  { %520 = vsyncpa [#allocation3 + $0x1], 1 }

</bundles_post_ra>
